<compile_context>
chip_gen: v7x
topology: tpu7x:2x2x1
jax: 0.10.0
libtpu: 0.0.40
codegen_flags: <defaults>
</compile_context>

<pallas_src>
import math

import jax
import jax.numpy as jnp
from jax.experimental import pallas as pl
from jax.experimental.pallas import tpu as pltpu


def _gelu(x):
    # tanh-approximation GELU (BERT-style), minimal-multiply form.
    c = math.sqrt(2.0 / math.pi)
    return 0.5 * x * (1.0 + jnp.tanh(c * x * (1.0 + 0.044715 * (x * x))))


def _cos_sim_head_kernel(x1_ref, x2_ref, w_ref, b_ref, sim_ref,
                         dot_acc, ss1_acc, ss2_acc):
    # x1_ref/x2_ref: [TB, Hp]  activation tiles (matmul dtype, e.g. bf16); held over n
    # w_ref        : [TN, Hp]  streamed weight chunk, PyTorch [out, in] layout
    # b_ref        : [1, TN]   f32 bias chunk
    # sim_ref      : [TB, 1]   output tile (revisited across n; written at last n)
    # *_acc        : [TB, 1]   f32 partial reductions, persist across the n axis
    n = pl.program_id(1)

    @pl.when(n == 0)
    def _():
        dot_acc[...] = jnp.zeros_like(dot_acc)
        ss1_acc[...] = jnp.zeros_like(ss1_acc)
        ss2_acc[...] = jnp.zeros_like(ss2_acc)

    w = w_ref[...]
    b = b_ref[...].astype(jnp.float32)
    dn = (((1,), (1,)), ((), ()))                 # contract x[., K] with w[., K] (trans_b)
    h1 = jax.lax.dot_general(x1_ref[...], w, dn, preferred_element_type=jnp.float32)
    h2 = jax.lax.dot_general(x2_ref[...], w, dn, preferred_element_type=jnp.float32)
    h1 = _gelu(h1 + b)                            # [TB, TN] f32
    h2 = _gelu(h2 + b)

    dot_acc[...] += jnp.sum(h1 * h2, axis=-1, keepdims=True)
    ss1_acc[...] += jnp.sum(h1 * h1, axis=-1, keepdims=True)
    ss2_acc[...] += jnp.sum(h2 * h2, axis=-1, keepdims=True)

    @pl.when(n == pl.num_programs(1) - 1)
    def _():
        eps2 = jnp.float32(1e-16)                 # == torch clamp(norm, 1e-8)
        inv = (jax.lax.rsqrt(jnp.maximum(ss1_acc[...], eps2)) *
               jax.lax.rsqrt(jnp.maximum(ss2_acc[...], eps2)))
        sim_ref[...] = (dot_acc[...] * inv + 1.0) * 0.5


def _round_up(x, m):
    return ((x + m - 1) // m) * m


def _vmem_capacity_bytes():
    try:
        return int(pltpu.get_tpu_info().vmem_capacity_bytes)
    except Exception:
        return 64 * 1024 * 1024                   # conservative fallback (v7x-sized)


def _prep(x, rows, cols, dtype):
    """Cast + zero-pad to (rows, cols); no-op / single pass when already aligned."""
    r, c = x.shape
    x = x.astype(dtype)
    if (r, c) == (rows, cols):
        return x
    return jnp.zeros((rows, cols), dtype).at[:r, :c].set(x)


def cos_sim_head(rep_sent1, rep_sent2, weight, bias, labels=None,
                 block_b=None, block_n=None, matmul_dtype=jnp.bfloat16):
    """Matches CosSimHead.forward: returns (loss, sim) if labels is given, else (sim,)."""
    B, H = rep_sent1.shape
    assert rep_sent2.shape == (B, H) and weight.shape == (H, H) and bias.shape == (H,)

    vmem_cap = _vmem_capacity_bytes()
    big_vmem = vmem_cap >= (100 << 20)            # v5e/v6e: 128 MiB; v7x: 64 MiB
    if block_b is None:
        block_b = 512 if big_vmem else 256
    if block_n is None:
        block_n = 1024 if big_vmem else 512

    # ---- batch tiling: >= 2 tiles when the batch allows (v7x has 2 TensorCores and
    # the batch axis is "parallel"); tiles rounded to the 8-row sublane.
    Bp8 = _round_up(B, 8)
    G = max(1, pl.cdiv(Bp8, block_b))
    if Bp8 >= 16 and G == 1:
        G = 2
    TB = _round_up(pl.cdiv(Bp8, G), 8)
    Bp = TB * G

    # ---- hidden padding: 256 fills the 2x256^2 MXU on v6e/v7x (slightly more padded
    # compute than 128 on v5e's 128-wide MXU; acceptable trade).
    Hp = _round_up(H, 256) if H > 128 else _round_up(H, 128)

    # ---- output-feature chunk for streaming the weight: largest <= block_n multiple
    # of 128 that divides Hp.
    TN = min(block_n, Hp)
    while Hp % TN:
        TN -= 128
    Nn = Hp // TN

    # ---- HBM-side prep (single pass each; bf16 cast happens here so both HBM traffic
    # and the MXU operands are half width; no transpose, no concat).
    x1 = _prep(rep_sent1, Bp, Hp, matmul_dtype)
    x2 = _prep(rep_sent2, Bp, Hp, matmul_dtype)
    w = _prep(weight, Hp, Hp, matmul_dtype)       # stays [out, in]
    b = _prep(bias.reshape(1, H), 1, Hp, jnp.float32)

    # ---- generation-aware VMEM budget.
    itm = jnp.dtype(matmul_dtype).itemsize
    need = (2 * TN * Hp * itm                     # weight chunk, double-buffered
            + 2 * 2 * TB * Hp * itm               # x1/x2 tiles, double-buffered
            + 6 * TB * TN * 4                     # f32 h1/h2 chunks + temporaries
            + 3 * TB * 128 * 4                    # accumulators (lane-padded)
            + (8 << 20))                          # compiler headroom
    cap = min(vmem_cap - (12 << 20), 100 << 20)   # ~52 MiB on v7x, 100 MiB on v5e/v6e
    vmem_limit = int(max(min(need, cap), 16 << 20))

    cost = pl.CostEstimate(
        flops=int(2 * (2 * Bp) * Hp * Hp),
        transcendentals=int(2 * Bp * Hp + 2 * Bp),
        bytes_accessed=int(2 * Bp * Hp * itm + G * Hp * Hp * itm + Hp * 4 + Bp * 4),
    )

    sim_col = pl.pallas_call(
        _cos_sim_head_kernel,
        out_shape=jax.ShapeDtypeStruct((Bp, 1), jnp.float32),
        grid=(G, Nn),
        in_specs=[
            pl.BlockSpec((TB, Hp), lambda i, n: (i, 0)),   # x1 tile (held across n)
            pl.BlockSpec((TB, Hp), lambda i, n: (i, 0)),   # x2 tile (held across n)
            pl.BlockSpec((TN, Hp), lambda i, n: (n, 0)),   # streamed weight chunk
            pl.BlockSpec((1, TN), lambda i, n: (0, n)),    # bias chunk
        ],
        out_specs=pl.BlockSpec((TB, 1), lambda i, n: (i, 0)),
        scratch_shapes=[pltpu.VMEM((TB, 1), jnp.float32)] * 3,
        compiler_params=pltpu.CompilerParams(
            dimension_semantics=("parallel", "arbitrary"),
            vmem_limit_bytes=vmem_limit,
        ),
        cost_estimate=cost,
    )(x1, x2, w, b)

    sim = sim_col[:B, 0]
    if labels is None:
        return (sim,)
    loss = jnp.mean((sim - labels.astype(sim.dtype)) ** 2)   # MSELoss(reduction='mean')
    return loss, sim


def _reference(rep1, rep2, weight, bias, labels, matmul_dtype=jnp.float32):
    # pure-JAX reference; matmul operand precision is matched to the kernel.
    w = weight.astype(matmul_dtype)
    h1 = _gelu(jnp.dot(rep1.astype(matmul_dtype), w.T,
                       preferred_element_type=jnp.float32) + bias.astype(jnp.float32))
    h2 = _gelu(jnp.dot(rep2.astype(matmul_dtype), w.T,
                       preferred_element_type=jnp.float32) + bias.astype(jnp.float32))
    eps = 1e-8
    dot = jnp.sum(h1 * h2, axis=-1)
    n1 = jnp.maximum(jnp.linalg.norm(h1, axis=-1), eps)
    n2 = jnp.maximum(jnp.linalg.norm(h2, axis=-1), eps)
    sim = (dot / (n1 * n2) + 1.0) * 0.5
    loss = jnp.mean((sim - labels) ** 2)
    return loss, sim


if __name__ == "__main__":
    B, H = 8, 32  # batch, hidden_size

    key = jax.random.PRNGKey(0)
    k1, k2, kw, kb, kl = jax.random.split(key, 5)

    rep_sent1 = jax.random.normal(k1, (B, H), dtype=jnp.float32)
    rep_sent2 = jax.random.normal(k2, (B, H), dtype=jnp.float32)
    # deterministic "LinearWithAct" parameters (hidden_size -> hidden_size)
    weight = jax.random.normal(kw, (H, H), dtype=jnp.float32) / jnp.sqrt(H)
    bias = jax.random.normal(kb, (H,), dtype=jnp.float32) * 0.01
    labels = jax.random.uniform(kl, (B,), dtype=jnp.float32)

    loss, sim = cos_sim_head(rep_sent1, rep_sent2, weight, bias, labels)
    jax.block_until_ready((loss, sim))

    # matched-precision reference (bf16 MXU operands, f32 accumulate / elementwise)
    ref_loss, ref_sim = _reference(rep_sent1, rep_sent2, weight, bias, labels,
                                   matmul_dtype=jnp.bfloat16)
    assert jnp.allclose(sim, ref_sim, atol=2e-3, rtol=2e-3)
    assert jnp.allclose(loss, ref_loss, atol=2e-3, rtol=2e-3)

    # loose cross-check against the full-f32 reference (bf16 operand rounding only)
    f32_loss, f32_sim = _reference(rep_sent1, rep_sent2, weight, bias, labels,
                                   matmul_dtype=jnp.float32)
    assert jnp.allclose(sim, f32_sim, atol=5e-2)
    assert jnp.allclose(loss, f32_loss, atol=5e-2)

    print("KERNEL_OK")
</pallas_src>

<mosaic_0001>
module attributes {stable_mosaic.version = 11 : i64} {
  func.func @_cos_sim_head_kernel(%arg0: i32, %arg1: i32, %arg2: memref<8x128xbf16, #tpu.memory_space<vmem>>, %arg3: memref<8x128xbf16, #tpu.memory_space<vmem>>, %arg4: memref<128x128xbf16, #tpu.memory_space<vmem>>, %arg5: memref<1x128xf32, #tpu.memory_space<vmem>>, %arg6: memref<8x1xf32, #tpu.memory_space<vmem>>, %arg7: memref<8x1xf32, #tpu.memory_space<vmem>>, %arg8: memref<8x1xf32, #tpu.memory_space<vmem>>, %arg9: memref<8x1xf32, #tpu.memory_space<vmem>>) attributes {dimension_semantics = [#tpu.dimension_semantics<parallel>, #tpu.dimension_semantics<arbitrary>], iteration_bounds = array<i64: 1, 1>, scalar_prefetch = 0 : i64, scratch_operands = 3 : i64, tpu.core_type = #tpu.core_type<tc>, window_params = [{transform_indices = @transform_0, window_bounds = array<i64: 8, 128>}, {transform_indices = @transform_1, window_bounds = array<i64: 8, 128>}, {transform_indices = @transform_2, window_bounds = array<i64: 128, 128>}, {transform_indices = @transform_3, window_bounds = array<i64: 1, 128>}, {transform_indices = @transform_4, window_bounds = array<i64: 8, 1>}]} {
    %c0_i32 = arith.constant 0 : i32
    %0 = arith.cmpi eq, %arg1, %c0_i32 : i32
    %1 = arith.extui %0 : i1 to i32
    %c0_i32_0 = arith.constant 0 : i32
    %2 = arith.cmpi ne, %1, %c0_i32_0 : i32
    scf.if %2 {
      %cst_36 = arith.constant 0.000000e+00 : f32
      %62 = vector.broadcast %cst_36 : f32 to vector<8x1xf32>
      %c0_37 = arith.constant 0 : index
      %c0_38 = arith.constant 0 : index
      %63 = vector.load %arg7[%c0_37, %c0_38] : memref<8x1xf32, #tpu.memory_space<vmem>>, vector<8x1xf32>
      tpu.vector_store %arg7[%c0_37, %c0_38], %62 {strides = array<i32>} : memref<8x1xf32, #tpu.memory_space<vmem>>, vector<8x1xf32>,
      %cst_39 = arith.constant 0.000000e+00 : f32
      %64 = vector.broadcast %cst_39 : f32 to vector<8x1xf32>
      %c0_40 = arith.constant 0 : index
      %c0_41 = arith.constant 0 : index
      %65 = vector.load %arg8[%c0_40, %c0_41] : memref<8x1xf32, #tpu.memory_space<vmem>>, vector<8x1xf32>
      tpu.vector_store %arg8[%c0_40, %c0_41], %64 {strides = array<i32>} : memref<8x1xf32, #tpu.memory_space<vmem>>, vector<8x1xf32>,
      %cst_42 = arith.constant 0.000000e+00 : f32
      %66 = vector.broadcast %cst_42 : f32 to vector<8x1xf32>
      %c0_43 = arith.constant 0 : index
      %c0_44 = arith.constant 0 : index
      %67 = vector.load %arg9[%c0_43, %c0_44] : memref<8x1xf32, #tpu.memory_space<vmem>>, vector<8x1xf32>
      tpu.vector_store %arg9[%c0_43, %c0_44], %66 {strides = array<i32>} : memref<8x1xf32, #tpu.memory_space<vmem>>, vector<8x1xf32>,
    } else {
    }
    %c0 = arith.constant 0 : index
    %c0_1 = arith.constant 0 : index
    %3 = vector.load %arg4[%c0, %c0_1] : memref<128x128xbf16, #tpu.memory_space<vmem>>, vector<128x128xbf16>
    %c0_2 = arith.constant 0 : index
    %c0_3 = arith.constant 0 : index
    %4 = vector.load %arg5[%c0_2, %c0_3] : memref<1x128xf32, #tpu.memory_space<vmem>>, vector<1x128xf32>
    %c0_4 = arith.constant 0 : index
    %c0_5 = arith.constant 0 : index
    %5 = vector.load %arg2[%c0_4, %c0_5] : memref<8x128xbf16, #tpu.memory_space<vmem>>, vector<8x128xbf16>
    %cst = arith.constant dense<0.000000e+00> : vector<8x128xf32>
    %6 = tpu.matmul %5, %3, %cst {dimension_numbers = #tpu.dot_dimension_numbers<[1], [1], [0], [0], [0, 0, 1, 0], [], []>} : vector<8x128xbf16>, vector<128x128xbf16>, vector<8x128xf32> -> vector<8x128xf32>
    %c0_6 = arith.constant 0 : index
    %c0_7 = arith.constant 0 : index
    %7 = vector.load %arg3[%c0_6, %c0_7] : memref<8x128xbf16, #tpu.memory_space<vmem>>, vector<8x128xbf16>
    %cst_8 = arith.constant dense<0.000000e+00> : vector<8x128xf32>
    %8 = tpu.matmul %7, %3, %cst_8 {dimension_numbers = #tpu.dot_dimension_numbers<[1], [1], [0], [0], [0, 0, 1, 0], [], []>} : vector<8x128xbf16>, vector<128x128xbf16>, vector<8x128xf32> -> vector<8x128xf32>
    %9 = vector.broadcast %4 : vector<1x128xf32> to vector<8x128xf32>
    %10 = arith.addf %6, %9 : vector<8x128xf32>
    %cst_9 = arith.constant 5.000000e-01 : f32
    %11 = vector.broadcast %cst_9 : f32 to vector<8x128xf32>
    %12 = arith.mulf %11, %10 : vector<8x128xf32>
    %cst_10 = arith.constant 0.797884583 : f32
    %13 = vector.broadcast %cst_10 : f32 to vector<8x128xf32>
    %14 = arith.mulf %13, %10 : vector<8x128xf32>
    %15 = arith.mulf %10, %10 : vector<8x128xf32>
    %cst_11 = arith.constant 4.471500e-02 : f32
    %16 = vector.broadcast %cst_11 : f32 to vector<8x128xf32>
    %17 = arith.mulf %16, %15 : vector<8x128xf32>
    %cst_12 = arith.constant 1.000000e+00 : f32
    %18 = vector.broadcast %cst_12 : f32 to vector<8x128xf32>
    %19 = arith.addf %18, %17 : vector<8x128xf32>
    %20 = arith.mulf %14, %19 : vector<8x128xf32>
    %21 = math.tanh %20 : vector<8x128xf32>
    %cst_13 = arith.constant 1.000000e+00 : f32
    %22 = vector.broadcast %cst_13 : f32 to vector<8x128xf32>
    %23 = arith.addf %22, %21 : vector<8x128xf32>
    %24 = arith.mulf %12, %23 : vector<8x128xf32>
    %25 = vector.broadcast %4 : vector<1x128xf32> to vector<8x128xf32>
    %26 = arith.addf %8, %25 : vector<8x128xf32>
    %cst_14 = arith.constant 5.000000e-01 : f32
    %27 = vector.broadcast %cst_14 : f32 to vector<8x128xf32>
    %28 = arith.mulf %27, %26 : vector<8x128xf32>
    %cst_15 = arith.constant 0.797884583 : f32
    %29 = vector.broadcast %cst_15 : f32 to vector<8x128xf32>
    %30 = arith.mulf %29, %26 : vector<8x128xf32>
    %31 = arith.mulf %26, %26 : vector<8x128xf32>
    %cst_16 = arith.constant 4.471500e-02 : f32
    %32 = vector.broadcast %cst_16 : f32 to vector<8x128xf32>
    %33 = arith.mulf %32, %31 : vector<8x128xf32>
    %cst_17 = arith.constant 1.000000e+00 : f32
    %34 = vector.broadcast %cst_17 : f32 to vector<8x128xf32>
    %35 = arith.addf %34, %33 : vector<8x128xf32>
    %36 = arith.mulf %30, %35 : vector<8x128xf32>
    %37 = math.tanh %36 : vector<8x128xf32>
    %cst_18 = arith.constant 1.000000e+00 : f32
    %38 = vector.broadcast %cst_18 : f32 to vector<8x128xf32>
    %39 = arith.addf %38, %37 : vector<8x128xf32>
    %40 = arith.mulf %28, %39 : vector<8x128xf32>
    %c0_19 = arith.constant 0 : index
    %c0_20 = arith.constant 0 : index
    %41 = vector.load %arg7[%c0_19, %c0_20] : memref<8x1xf32, #tpu.memory_space<vmem>>, vector<8x1xf32>
    %42 = arith.mulf %24, %40 : vector<8x128xf32>
    %cst_21 = arith.constant dense<0.000000e+00> : vector<8xf32>
    %43 = vector.multi_reduction <add>, %42, %cst_21 [1] : vector<8x128xf32> to vector<8xf32>
    %44 = vector.shape_cast %43 : vector<8xf32> to vector<8x1xf32>
    %45 = arith.addf %41, %44 : vector<8x1xf32>
    %c0_22 = arith.constant 0 : index
    %c0_23 = arith.constant 0 : index
    %46 = vector.load %arg7[%c0_22, %c0_23] : memref<8x1xf32, #tpu.memory_space<vmem>>, vector<8x1xf32>
    tpu.vector_store %arg7[%c0_22, %c0_23], %45 {strides = array<i32>} : memref<8x1xf32, #tpu.memory_space<vmem>>, vector<8x1xf32>,
    %c0_24 = arith.constant 0 : index
    %c0_25 = arith.constant 0 : index
    %47 = vector.load %arg8[%c0_24, %c0_25] : memref<8x1xf32, #tpu.memory_space<vmem>>, vector<8x1xf32>
    %48 = arith.mulf %24, %24 : vector<8x128xf32>
    %cst_26 = arith.constant dense<0.000000e+00> : vector<8xf32>
    %49 = vector.multi_reduction <add>, %48, %cst_26 [1] : vector<8x128xf32> to vector<8xf32>
    %50 = vector.shape_cast %49 : vector<8xf32> to vector<8x1xf32>
    %51 = arith.addf %47, %50 : vector<8x1xf32>
    %c0_27 = arith.constant 0 : index
    %c0_28 = arith.constant 0 : index
    %52 = vector.load %arg8[%c0_27, %c0_28] : memref<8x1xf32, #tpu.memory_space<vmem>>, vector<8x1xf32>
    tpu.vector_store %arg8[%c0_27, %c0_28], %51 {strides = array<i32>} : memref<8x1xf32, #tpu.memory_space<vmem>>, vector<8x1xf32>,
    %c0_29 = arith.constant 0 : index
    %c0_30 = arith.constant 0 : index
    %53 = vector.load %arg9[%c0_29, %c0_30] : memref<8x1xf32, #tpu.memory_space<vmem>>, vector<8x1xf32>
    %54 = arith.mulf %40, %40 : vector<8x128xf32>
    %cst_31 = arith.constant dense<0.000000e+00> : vector<8xf32>
    %55 = vector.multi_reduction <add>, %54, %cst_31 [1] : vector<8x128xf32> to vector<8xf32>
    %56 = vector.shape_cast %55 : vector<8xf32> to vector<8x1xf32>
    %57 = arith.addf %53, %56 : vector<8x1xf32>
    %c0_32 = arith.constant 0 : index
    %c0_33 = arith.constant 0 : index
    %58 = vector.load %arg9[%c0_32, %c0_33] : memref<8x1xf32, #tpu.memory_space<vmem>>, vector<8x1xf32>
    tpu.vector_store %arg9[%c0_32, %c0_33], %57 {strides = array<i32>} : memref<8x1xf32, #tpu.memory_space<vmem>>, vector<8x1xf32>,
    %c0_i32_34 = arith.constant 0 : i32
    %59 = arith.cmpi eq, %arg1, %c0_i32_34 : i32
    %60 = arith.extui %59 : i1 to i32
    %c0_i32_35 = arith.constant 0 : i32
    %61 = arith.cmpi ne, %60, %c0_i32_35 : i32
    scf.if %61 {
      %c0_36 = arith.constant 0 : index
      %c0_37 = arith.constant 0 : index
      %62 = vector.load %arg8[%c0_36, %c0_37] : memref<8x1xf32, #tpu.memory_space<vmem>>, vector<8x1xf32>
      %cst_38 = arith.constant 1.000000e-16 : f32
      %63 = vector.broadcast %cst_38 : f32 to vector<8x1xf32>
      %64 = arith.maximumf %62, %63 : vector<8x1xf32>
      %65 = math.rsqrt %64 : vector<8x1xf32>
      %c0_39 = arith.constant 0 : index
      %c0_40 = arith.constant 0 : index
      %66 = vector.load %arg9[%c0_39, %c0_40] : memref<8x1xf32, #tpu.memory_space<vmem>>, vector<8x1xf32>
      %cst_41 = arith.constant 1.000000e-16 : f32
      %67 = vector.broadcast %cst_41 : f32 to vector<8x1xf32>
      %68 = arith.maximumf %66, %67 : vector<8x1xf32>
      %69 = math.rsqrt %68 : vector<8x1xf32>
      %70 = arith.mulf %65, %69 : vector<8x1xf32>
      %c0_42 = arith.constant 0 : index
      %c0_43 = arith.constant 0 : index
      %71 = vector.load %arg7[%c0_42, %c0_43] : memref<8x1xf32, #tpu.memory_space<vmem>>, vector<8x1xf32>
      %72 = arith.mulf %71, %70 : vector<8x1xf32>
      %cst_44 = arith.constant 1.000000e+00 : f32
      %73 = vector.broadcast %cst_44 : f32 to vector<8x1xf32>
      %74 = arith.addf %72, %73 : vector<8x1xf32>
      %cst_45 = arith.constant 5.000000e-01 : f32
      %75 = vector.broadcast %cst_45 : f32 to vector<8x1xf32>
      %76 = arith.mulf %74, %75 : vector<8x1xf32>
      %c0_46 = arith.constant 0 : index
      %c0_47 = arith.constant 0 : index
      %77 = vector.load %arg6[%c0_46, %c0_47] : memref<8x1xf32, #tpu.memory_space<vmem>>, vector<8x1xf32>
      tpu.vector_store %arg6[%c0_46, %c0_47], %76 {strides = array<i32>} : memref<8x1xf32, #tpu.memory_space<vmem>>, vector<8x1xf32>,
    } else {
    }
    return
  }
  func.func @transform_0(%arg0: i32, %arg1: i32) -> (i32, i32) {
    %c0_i32 = arith.constant 0 : i32
    %c0_i32_0 = arith.constant 0 : i32
    return %arg0, %c0_i32 : i32, i32
  }
  func.func @transform_1(%arg0: i32, %arg1: i32) -> (i32, i32) {
    %c0_i32 = arith.constant 0 : i32
    %c0_i32_0 = arith.constant 0 : i32
    return %arg0, %c0_i32 : i32, i32
  }
  func.func @transform_2(%arg0: i32, %arg1: i32) -> (i32, i32) {
    %c0_i32 = arith.constant 0 : i32
    %c0_i32_0 = arith.constant 0 : i32
    return %arg1, %c0_i32 : i32, i32
  }
  func.func @transform_3(%arg0: i32, %arg1: i32) -> (i32, i32) {
    %c0_i32 = arith.constant 0 : i32
    %c0_i32_0 = arith.constant 0 : i32
    return %c0_i32, %arg1 : i32, i32
  }
  func.func @transform_4(%arg0: i32, %arg1: i32) -> (i32, i32) {
    %c0_i32 = arith.constant 0 : i32
    %c0_i32_0 = arith.constant 0 : i32
    return %arg0, %c0_i32 : i32, i32
  }
}

</mosaic_0001>

<bundles_post_ra>
// kernel: tpu_custom_call.1
= control target key start
LH: loop header
LB: loop body
LE: loop exit
PB: predicated region body
PF: predicated region fallthrough
CT: control target
= control target key end

     0   :  { %9 = vsyncpa [#allocation6], 0  ;;  %s515_s0 = inlined_call_operand.hbm [shape: bf16[8,128], index: 0, kind: input, shape index: {}]   ;;  %s516_s1 = inlined_call_operand.hbm [shape: bf16[8,128], index: 1, kind: input, shape index: {}]   ;;  %s517_s2 = inlined_call_operand.hbm [shape: bf16[128,128], index: 2, kind: input, shape index: {}]   ;;  %s518_s3 = inlined_call_operand.vmem [shape: f32[1,128], index: 3, kind: input, shape index: {}]   ;;  %s519_s4 = inlined_call_operand.vmem [shape: f32[8,1], index: 4, kind: output, shape index: {}]  }
   0x1   :  { %10 = vsyncpa [#allocation8], 0  ;;  %s434_s15 = smov [#allocation7]   ;;  %s435_s17 = smov [#allocation5]  }
   0x2   :  { %s27_s16 = sshll.u32 %s434_s15, 4  ;;  %s17_s18 = sshll.u32 %s435_s17, 4  ;;  %s28_s16 = int_to_ptr.vmem [resolvable:$true] %s27_s16  ;;  %s18_s18 = int_to_ptr.vmem [resolvable:$true] %s17_s18 }
   0x3   :  { %s364_s21 = scalar_lea.hbm %s516_s1, 64 }
   0x4   :  { %p365_p0 = scmp.ne.s32.totalorder %s516_s1, %s364_s21  ;;  %p368_p1 = scmp.lt.u32.totalorder %s364_s21, %s516_s1 }
   0x6   :  { %p370_p2 = pnand %p368_p1, %p365_p0 }
   0x8   :  { %373 = shalt.err (!%p370_p2)
}
   0x9   :  { %s374_s26 = scalar_lea.vmem %s28_s16, 64  ;;  %p379_p4 = scmp.lt.s32.totalorder %s28_s16, %s28_s16 }
   0xa   :  { %p375_p3 = scmp.ne.s32.totalorder %s28_s16, %s374_s26  ;;  %p380_p5 = scmp.lt.s32.totalorder %s374_s26, %s374_s26 }
   0xc   :  { %p381_p6 = por %p380_p5, %p379_p4 }
   0xe   :  { %p382_p7 = pnand %p381_p6, %p375_p3 }
  0x10   :  { %385 = shalt.err (!%p382_p7)
}
  0x11   :  { %30 = dma.hbm_to_vmem [thread:$0]  %s516_s1, 64, %s28_s16, [#allocation8]  }
  0x12   :  { %s386_s5 = scalar_lea.hbm %s515_s0, 64 }
  0x13   :  { %p387_p8 = scmp.ne.s32.totalorder %s515_s0, %s386_s5  ;;  %p390_p9 = scmp.lt.u32.totalorder %s386_s5, %s515_s0 }
  0x15   :  { %p392_p10 = pnand %p390_p9, %p387_p8 }
  0x17   :  { %395 = shalt.err (!%p392_p10)
}
  0x18   :  { %s396_s10 = scalar_lea.vmem %s18_s18, 64  ;;  %p401_p12 = scmp.lt.s32.totalorder %s18_s18, %s18_s18 }
  0x19   :  { %p397_p11 = scmp.ne.s32.totalorder %s18_s18, %s396_s10  ;;  %p402_p13 = scmp.lt.s32.totalorder %s396_s10, %s396_s10 }
  0x1b   :  { %p403_p0 = por %p402_p13, %p401_p12 }
  0x1d   :  { %p404_p1 = pnand %p403_p0, %p397_p11 }
  0x1f   :  { %407 = shalt.err (!%p404_p1)
}
  0x20   :  { %20 = dma.hbm_to_vmem [thread:$0]  %s515_s0, 64, %s18_s18, [#allocation6]  }
  0x21   :  { %s436_s12 = smov [#allocation9]   ;;  %s408_s16 = scalar_lea.hbm %s517_s2, 1024 }
  0x22   :  { %s36_s13 = sshll.u32 %s436_s12, 4  ;;  %p409_p2 = scmp.ne.s32.totalorder %s517_s2, %s408_s16  ;;  %s37_s13 = int_to_ptr.vmem [resolvable:$true] %s36_s13 }
  0x23   :  { %p412_p3 = scmp.lt.u32.totalorder %s408_s16, %s517_s2 }
  0x25   :  { %p414_p4 = pnand %p412_p3, %p409_p2 }
  0x27   :  { %417 = shalt.err (!%p414_p4)
}
  0x28   :  { %s418_s22 = scalar_lea.vmem %s37_s13, 1024  ;;  %p423_p6 = scmp.lt.s32.totalorder %s37_s13, %s37_s13 }
  0x29   :  { %p419_p5 = scmp.ne.s32.totalorder %s37_s13, %s418_s22  ;;  %p424_p7 = scmp.lt.s32.totalorder %s418_s22, %s418_s22 }
  0x2b   :  { %p425_p8 = por %p424_p7, %p423_p6 }
  0x2d   :  { %p426_p9 = pnand %p425_p8, %p419_p5 }
  0x2f   :  { %429 = shalt.err (!%p426_p9)
}
  0x30   :  { %s437_s0 = smov 64   ;;  %s438_s18 = smov 4  }
  0x31   :  { %42 = dma.hbm_to_vmem [thread:$0]  %s517_s2, 1024, %s37_s13, [#allocation8], %s437_s0, %s437_s0, %s438_s18  }
  0x32   :  { %430 = dma.done.wait [#allocation6], 64  }
  0x33   :  { %431 = vsyncadd [#allocation6], 4294967232 }
  0x34   :  { %432 = dma.done.wait [#allocation8], 1088  }
  0x35   :  { %433 = vsyncadd [#allocation8], 4294966208  ;;  %v439_v0 = vmov 0.0   ;;  %vm440_vm0 = vmmov 0   ;;  %v348_v1 = vld [vmem:[#allocation9] sm:$0xff]   ;;  %v349_v2 = vld [vmem:[#allocation9 + $0x8] sm:$0xff]  }
  0x36   :  { %301 = vmatprep.subr.bf16.mxu0 %v439_v0  ;;  %321 = vmatprep.subr.bf16.mxu1 %v439_v0  ;;  %v350_v3 = vld [vmem:[#allocation9 + $0x10] sm:$0xff]   ;;  %v351_v4 = vld [vmem:[#allocation9 + $0x18] sm:$0xff]   ;;  %v352_v5 = vld [vmem:[#allocation9 + $0x20] sm:$0xff]   ;;  %vm59_vm1 = vcmask 7168  }
  0x37   :  { %317 = vmatprep.mubr.msk.bf16.mxu0 %vm440_vm0, %v439_v0  ;;  %337 = vmatprep.mubr.msk.bf16.mxu1 %vm440_vm0, %v439_v0  ;;  %v353_v6 = vld [vmem:[#allocation9 + $0x28] sm:$0xff]   ;;  %v354_v7 = vld [vmem:[#allocation9 + $0x30] sm:$0xff]   ;;  %v355_v8 = vld [vmem:[#allocation9 + $0x38] sm:$0xff]   ;;  %61 = vst.msk [vmem:[#allocation3] sm:$0xff] %vm59_vm1, %v439_v0 }
  0x38   :  { %302 = vmatpush3.bf16.xpose.msra.mxu0 %v348_v1  ;;  %322 = vmatpush3.bf16.xpose.msra.mxu1 %v348_v1  ;;  %v80_v9 = vld [vmem:[#allocation5] sm:$0xf]  ;;  %v81_v10 = vld [vmem:[#allocation7] sm:$0xf]  ;;  %60 = vst.msk [vmem:[#allocation2] sm:$0xff] %vm59_vm1, %v439_v0  ;;  %62 = vst.msk [vmem:[#allocation4] sm:$0xff] %vm59_vm1, %v439_v0 }
  0x39   :  { %303 = vmatprep.subr.bf16.mxu0 %v439_v0  ;;  %323 = vmatprep.subr.bf16.mxu1 %v439_v0  ;;  %v274_v11 = vld [vmem:[%s518_s3] ss:$0 sm:$0xff] }
  0x3e   :  { %v241_v43 = vld [vmem:[#allocation3] sm:$0xff] }
  0x3f   :  { %v234_v44 = vld [vmem:[#allocation2] sm:$0xff]  ;;  %v247_v49 = vld [vmem:[#allocation4] sm:$0xff] }
  0x40   :  { %304 = vmatpush3.bf16.xpose.msra.mxu0 %v349_v2  ;;  %324 = vmatpush3.bf16.xpose.msra.mxu1 %v349_v2 }
  0x41   :  { %305 = vmatprep.subr.bf16.mxu0 %v439_v0  ;;  %325 = vmatprep.subr.bf16.mxu1 %v439_v0 }
  0x48   :  { %306 = vmatpush3.bf16.xpose.msra.mxu0 %v350_v3  ;;  %326 = vmatpush3.bf16.xpose.msra.mxu1 %v350_v3 }
  0x49   :  { %307 = vmatprep.subr.bf16.mxu0 %v439_v0  ;;  %327 = vmatprep.subr.bf16.mxu1 %v439_v0 }
  0x50   :  { %308 = vmatpush3.bf16.xpose.msra.mxu0 %v351_v4  ;;  %328 = vmatpush3.bf16.xpose.msra.mxu1 %v351_v4 }
  0x51   :  { %309 = vmatprep.subr.bf16.mxu0 %v439_v0  ;;  %329 = vmatprep.subr.bf16.mxu1 %v439_v0 }
  0x58   :  { %310 = vmatpush3.bf16.xpose.msra.mxu0 %v352_v5  ;;  %330 = vmatpush3.bf16.xpose.msra.mxu1 %v352_v5 }
  0x59   :  { %311 = vmatprep.subr.bf16.mxu0 %v439_v0  ;;  %331 = vmatprep.subr.bf16.mxu1 %v439_v0 }
  0x60   :  { %312 = vmatpush3.bf16.xpose.msra.mxu0 %v353_v6  ;;  %332 = vmatpush3.bf16.xpose.msra.mxu1 %v353_v6 }
  0x61   :  { %313 = vmatprep.subr.bf16.mxu0 %v439_v0  ;;  %333 = vmatprep.subr.bf16.mxu1 %v439_v0 }
  0x68   :  { %314 = vmatpush3.bf16.xpose.msra.mxu0 %v354_v7  ;;  %334 = vmatpush3.bf16.xpose.msra.mxu1 %v354_v7 }
  0x69   :  { %315 = vmatprep.subr.bf16.mxu0 %v439_v0  ;;  %335 = vmatprep.subr.bf16.mxu1 %v439_v0 }
  0x70   :  { %316 = vmatpush3.bf16.xpose.msra.mxu0 %v355_v8  ;;  %336 = vmatpush3.bf16.xpose.msra.mxu1 %v355_v8 }
  0x77   :  { %318 = vmatmul.mubr.bf16.vlgmr.msra.gmra.mrb[0].mxu0 %v80_v9  ;;  %338 = vmatmul.mubr.bf16.vlgmr.msra.gmra.mrb[0].mxu1 %v81_v10 }
 0x14a   :  { %v170_v12 = vpop.f32.mrb[0].mxu0  ;;  %v219_v13 = vpop.f32.mrb[0].mxu1 }
 0x14b   :  { %v171_v14 = vadd.f32 %v274_v11, %v170_v12  ;;  %v220_v15 = vadd.f32 %v274_v11, %v219_v13  ;;  %v319_v16 = vpop.f32.mrb[1].mxu0  ;;  %v339_v17 = vpop.f32.mrb[1].mxu1 }
 0x14c   :  { %v173_v18 = vpop.f32.mrb[2].mxu0  ;;  %v222_v19 = vpop.f32.mrb[2].mxu1 }
 0x14d   :  { %v178_v20 = vmul.f32 %v171_v14, %v171_v14  ;;  %v227_v21 = vmul.f32 %v220_v15, %v220_v15  ;;  %v320_v22 = vpop.f32.mrb[3].mxu0  ;;  %v340_v23 = vpop.f32.mrb[3].mxu1  ;;  %v226_v25 = vmul.f32 0.7978846, %v220_v15  ;;  %v177_v27 = vmul.f32 0.7978846, %v171_v14 }
 0x14e   :  { %v176_v34 = vmul.f32 0.5, %v171_v14  ;;  %v225_v36 = vmul.f32 0.5, %v220_v15 }
 0x14f   :  { %v179_v24 = vmul.f32 0.044715, %v178_v20  ;;  %v228_v26 = vmul.f32 0.044715, %v227_v21 }
 0x151   :  { %v180_v28 = vadd.f32 1.0, %v179_v24  ;;  %v229_v29 = vadd.f32 1.0, %v228_v26 }
 0x153   :  { %v181_v30 = vmul.f32 %v180_v28, %v177_v27  ;;  %v230_v31 = vmul.f32 %v229_v29, %v226_v25 }
 0x155   :  { %356 = vtanh.f32 %v181_v30 }
 0x156   :  { %358 = vtanh.f32 %v230_v31 }
 0x15f   :  { %v357_v32 = vpop.eup %356 }
 0x160   :  { %v359_v33 = vpop.eup %358  ;;  %v183_v35 = vadd.f32 1.0, %v357_v32 }
 0x161   :  { %v232_v37 = vadd.f32 1.0, %v359_v33 }
 0x162   :  { %v184_v38 = vmul.f32 %v183_v35, %v176_v34 }
 0x163   :  { %v233_v39 = vmul.f32 %v232_v37, %v225_v36 }
 0x164   :  { %v242_v40 = vmul.f32 %v184_v38, %v184_v38 }
 0x165   :  { %v235_v41 = vmul.f32 %v233_v39, %v184_v38  ;;  %v248_v42 = vmul.f32 %v233_v39, %v233_v39 }
 0x166   :  { %243 = vadd.xlane.f32.xlu0 %v242_v40 }
 0x167   :  { %236 = vadd.xlane.f32.xlu1 %v235_v41 }
 0x16a   :  { %249 = vadd.xlane.f32.xlu0 %v248_v42 }
 0x1f3   :  { %v244_v45 = vpop.xlane.xlu0 %243 }
 0x1f4   :  { %v245_v46 = vadd.f32 %v244_v45, %v241_v43  ;;  %v237_v47 = vpop.xlane.xlu1 %236 }
 0x1f5   :  { %v238_v48 = vadd.f32 %v237_v47, %v234_v44 }
 0x1f6   :  { %246 = vst.msk [vmem:[#allocation3] sm:$0xff] %vm59_vm1, %v245_v46 }
 0x1f7   :  { %240 = vst.msk [vmem:[#allocation2] sm:$0xff] %vm59_vm1, %v238_v48  ;;  %v250_v50 = vpop.xlane.xlu0 %249 }
 0x1f8   :  { %v251_v51 = vadd.f32 %v250_v50, %v247_v49 }
 0x1fa   :  { %252 = vst.msk [vmem:[#allocation4] sm:$0xff] %vm59_vm1, %v251_v51 }
 0x1fd   :  { %v256_v52 = vld [vmem:[#allocation3] sm:$0xff] }
 0x1fe   :  { %v257_v53 = vmax.f32 %v256_v52, 1e-16  ;;  %v263_v59 = vld [vmem:[#allocation2] sm:$0xff] }
 0x200   :  { %360 = vrsqrt.f32 %v257_v53 }
 0x201   :  { %v259_v54 = vld [vmem:[#allocation4] sm:$0xff] }
 0x202   :  { %v260_v55 = vmax.f32 %v259_v54, 1e-16 }
 0x204   :  { %362 = vrsqrt.f32 %v260_v55 }
 0x20a   :  { %v361_v56 = vpop.eup %360 }
 0x20e   :  { %v363_v57 = vpop.eup %362 }
 0x20f   :  { %v262_v58 = vmul.f32 %v363_v57, %v361_v56 }
 0x211   :  { %v264_v60 = vmul.f32 %v263_v59, %v262_v58 }
 0x213   :  { %v265_v61 = vadd.f32 1.0, %v264_v60 }
 0x215   :  { %v266_v62 = vmul.f32 0.5, %v265_v61 }
 0x217   :  { %267 = vst.msk [vmem:[%s519_s4] sm:$0xff] %vm59_vm1, %v266_v62 }
 0x218   :  { %272 = vsyncpa [#allocation6], 1 }
 0x219   :  { %273 = vsyncpa [#allocation8], 1 }

</bundles_post_ra>
